<compile_context>
chip_gen: v6e
topology: v6e:2x2x1
jax: 0.10.0
libtpu: 0.0.40
codegen_flags: <defaults>
</compile_context>

<pallas_src>
import jax
import jax.numpy as jnp
from jax import lax
from jax.experimental import pallas as pl
from jax.experimental.pallas import tpu as pltpu


def memory_read_kernel(q_ref, k_ref, normal_ref, abnormal_ref):
    q = q_ref[...]          # (TM, D) f32 query rows
    keys = k_ref[...]       # (M,  D) f32 memory items
    tm = q.shape[0]
    M = keys.shape[0]

    # scores_t[m, i] = <query_i, key_m>: memory axis on sublanes, query rows on
    # the lane axis.  Contract the last dim of both operands so no explicit
    # transpose of `keys` is materialised before the MXU.
    scores_t = lax.dot_general(
        keys, q, dimension_numbers=(((1,), (1,)), ((), ())),
        preferred_element_type=jnp.float32)                     # (M, TM)

    # softmax over the memory dimension (PyTorch dim=1 of (N, M) == axis 0 here)
    mx = jnp.max(scores_t, axis=0, keepdims=True)               # (1, TM)
    e = jnp.exp(scores_t - mx)
    sm = e / jnp.sum(e, axis=0, keepdims=True)                  # (M, TM)

    # rank[m, i] = number of memory slots that come before slot m in a
    # descending stable sort of column i (lower index wins on exact ties).
    # Pure VPU compares / adds on lane-dense (M, TM) slabs -- no argmax loop,
    # no cross-lane XLU reductions.
    row = lax.broadcasted_iota(jnp.int32, sm.shape, 0)           # memory index
    rank = jnp.zeros(sm.shape, jnp.float32)
    for j in range(M):                                           # M is small
        vj = sm[j:j + 1, :]                                      # (1, TM) bcast
        beats = (vj > sm) | ((vj == sm) & (j < row))
        rank = rank + beats.astype(jnp.float32)

    top_mask = (rank < 5.0).astype(jnp.float32)                  # best 5 slots
    bot_mask = ((rank >= 5.0) & (rank < 10.0)).astype(jnp.float32)  # next 5

    # Softmax restricted to the selected slots (temperature 1).  sm in (0, 1],
    # so exp() cannot overflow: one exp serves both branches, no max-shift,
    # no -inf masking.  Sums over >= 5 entries each >= 1, so no divide-by-0.
    esm = jnp.exp(sm)                                            # (M, TM)
    tw = esm * top_mask
    bw = esm * bot_mask
    p_top = tw / jnp.sum(tw, axis=0, keepdims=True)              # (M, TM)
    p_bot = bw / jnp.sum(bw, axis=0, keepdims=True)              # (M, TM)

    # Weighted read of the memory items.  p_* are zero outside the selected
    # slots, so contracting over the full memory axis equals reading only the
    # selected items.  Fuse both reads into one MXU pass when the row tile is
    # lane-aligned (production path, TM % 128 == 0).
    dn = (((0,), (0,)), ((), ()))
    if tm % 128 == 0:
        pc = jnp.concatenate([p_top, p_bot], axis=1)             # (M, 2*TM)
        both = lax.dot_general(pc, keys, dimension_numbers=dn,
                               preferred_element_type=jnp.float32)  # (2TM, D)
        top_out = both[:tm, :]
        bot_out = both[tm:, :]
    else:
        top_out = lax.dot_general(p_top, keys, dimension_numbers=dn,
                                  preferred_element_type=jnp.float32)
        bot_out = lax.dot_general(p_bot, keys, dimension_numbers=dn,
                                  preferred_element_type=jnp.float32)

    normal_ref[...] = 0.5 * q + 0.5 * top_out
    abnormal_ref[...] = 0.01 * q + 0.99 * bot_out


def _round_up(x, m):
    return (x + m - 1) // m * m


def memory_forward(query, m_items, *, block_rows=128):
    """query: (N, key_dim) f32, m_items: (memory_size, key_dim) f32."""
    query = jnp.asarray(query, jnp.float32)
    m_items = jnp.asarray(m_items, jnp.float32)
    N, D = query.shape
    M, Dk = m_items.shape
    assert D == Dk and M >= 10

    # Row tile: full batch when small, otherwise 128 lane-dense rows per step.
    tm = min(block_rows, _round_up(max(N, 1), 8))
    n_pad = _round_up(N, tm)
    q = query if n_pad == N else jnp.pad(query, ((0, n_pad - N), (0, 0)))
    grid = (n_pad // tm,)

    cost = pl.CostEstimate(
        flops=6 * n_pad * M * D,            # scores + two (fused) readouts
        transcendentals=2 * n_pad * M,      # exp(scores - mx) and exp(sm)
        bytes_accessed=4 * (3 * n_pad * D + M * D),
    )

    out_shape = (
        jax.ShapeDtypeStruct((n_pad, D), jnp.float32),
        jax.ShapeDtypeStruct((n_pad, D), jnp.float32),
    )
    normal, abnormal = pl.pallas_call(
        memory_read_kernel,
        out_shape=out_shape,
        grid=grid,
        in_specs=[
            pl.BlockSpec((tm, D), lambda i: (i, 0)),   # query tile (pipelined)
            pl.BlockSpec((M, D), lambda i: (0, 0)),    # keys: resident block
        ],
        out_specs=(
            pl.BlockSpec((tm, D), lambda i: (i, 0)),
            pl.BlockSpec((tm, D), lambda i: (i, 0)),
        ),
        compiler_params=pltpu.CompilerParams(
            dimension_semantics=("parallel",),         # megacore-shardable
            vmem_limit_bytes=32 * 1024 * 1024,         # safe on v5e/v6e/v7x
        ),
        cost_estimate=cost,
    )(q, m_items)

    if n_pad != N:
        normal = normal[:N]
        abnormal = abnormal[:N]
    return normal, abnormal


def init_m_items(key, memory_size, key_dim):
    # Mirrors: F.normalize(torch.rand((memory_size, key_dim)), dim=1)
    raw = jax.random.uniform(key, (memory_size, key_dim), dtype=jnp.float32)
    norm = jnp.sqrt(jnp.sum(raw * raw, axis=1, keepdims=True))
    return raw / jnp.maximum(norm, 1e-12)


if __name__ == "__main__":
    memory_size = 16
    key_dim = 128
    batch = 8

    root = jax.random.PRNGKey(0)
    k_mem, k_q1, k_q2 = jax.random.split(root, 3)

    m_items = init_m_items(k_mem, memory_size, key_dim)

    # Small demo shape (single 8-row tile, unfused readout path).
    query_small = jax.random.normal(k_q1, (batch, key_dim), dtype=jnp.float32)
    normal_s, abnormal_s = memory_forward(query_small, m_items)

    # Larger batch exercising the tiled / padded / fused-readout path
    # (200 rows -> padded to 256 = two 128-row "parallel" grid steps).
    query_big = jax.random.normal(k_q2, (200, key_dim), dtype=jnp.float32)
    normal_b, abnormal_b = memory_forward(query_big, m_items)

    jax.block_until_ready((normal_s, abnormal_s, normal_b, abnormal_b))

    assert normal_s.shape == (batch, key_dim)
    assert abnormal_s.shape == (batch, key_dim)
    assert normal_b.shape == (200, key_dim)
    assert abnormal_b.shape == (200, key_dim)
    for t in (normal_s, abnormal_s, normal_b, abnormal_b):
        assert bool(jnp.all(jnp.isfinite(t)))

    print("KERNEL_OK")
</pallas_src>

<mosaic_0001>
module attributes {stable_mosaic.version = 11 : i64} {
  func.func @memory_read_kernel(%arg0: i32, %arg1: memref<8x128xf32, #tpu.memory_space<vmem>>, %arg2: memref<16x128xf32, #tpu.memory_space<vmem>>, %arg3: memref<8x128xf32, #tpu.memory_space<vmem>>, %arg4: memref<8x128xf32, #tpu.memory_space<vmem>>) attributes {dimension_semantics = [#tpu.dimension_semantics<parallel>], iteration_bounds = array<i64: 1>, scalar_prefetch = 0 : i64, scratch_operands = 0 : i64, tpu.core_type = #tpu.core_type<tc>, window_params = [{transform_indices = @transform_0, window_bounds = array<i64: 8, 128>}, {pipeline_mode = #tpu.pipeline_mode<synchronous>, transform_indices = @transform_1, window_bounds = array<i64: 16, 128>}, {transform_indices = @transform_2, window_bounds = array<i64: 8, 128>}, {transform_indices = @transform_3, window_bounds = array<i64: 8, 128>}]} {
    %c0 = arith.constant 0 : index
    %c0_0 = arith.constant 0 : index
    %0 = vector.load %arg1[%c0, %c0_0] : memref<8x128xf32, #tpu.memory_space<vmem>>, vector<8x128xf32>
    %c0_1 = arith.constant 0 : index
    %c0_2 = arith.constant 0 : index
    %1 = vector.load %arg2[%c0_1, %c0_2] : memref<16x128xf32, #tpu.memory_space<vmem>>, vector<16x128xf32>
    %cst = arith.constant dense<0.000000e+00> : vector<16x8xf32>
    %2 = tpu.matmul %1, %0, %cst {dimension_numbers = #tpu.dot_dimension_numbers<[1], [1], [0], [0], [0, 0, 1, 0], [], []>} : vector<16x128xf32>, vector<8x128xf32>, vector<16x8xf32> -> vector<16x8xf32>
    %cst_3 = arith.constant dense<0xFF800000> : vector<8xf32>
    %3 = vector.multi_reduction <maximumf>, %2, %cst_3 [0] : vector<16x8xf32> to vector<8xf32>
    %4 = vector.shape_cast %3 : vector<8xf32> to vector<1x8xf32>
    %5 = vector.broadcast %4 : vector<1x8xf32> to vector<16x8xf32>
    %6 = arith.subf %2, %5 : vector<16x8xf32>
    %7 = math.exp %6 : vector<16x8xf32>
    %cst_4 = arith.constant dense<0.000000e+00> : vector<8xf32>
    %8 = vector.multi_reduction <add>, %7, %cst_4 [0] : vector<16x8xf32> to vector<8xf32>
    %9 = vector.shape_cast %8 : vector<8xf32> to vector<1x8xf32>
    %10 = vector.broadcast %9 : vector<1x8xf32> to vector<16x8xf32>
    %11 = arith.divf %7, %10 : vector<16x8xf32>
    %12 = tpu.iota {dimensions = array<i32: 0>} : vector<16x8xi32>
    %cst_5 = arith.constant 0.000000e+00 : f32
    %13 = vector.broadcast %cst_5 : f32 to vector<16x8xf32>
    %14 = vector.extract_strided_slice %11 {offsets = [0, 0], sizes = [1, 8], strides = [1, 1]} : vector<16x8xf32> to vector<1x8xf32>
    %15 = vector.broadcast %14 : vector<1x8xf32> to vector<16x8xf32>
    %16 = arith.cmpf ogt, %15, %11 : vector<16x8xf32>
    %17 = vector.broadcast %14 : vector<1x8xf32> to vector<16x8xf32>
    %18 = arith.cmpf oeq, %17, %11 : vector<16x8xf32>
    %c0_i32 = arith.constant 0 : i32
    %19 = vector.broadcast %c0_i32 : i32 to vector<16x8xi32>
    %20 = arith.cmpi sgt, %12, %19 : vector<16x8xi32>
    %21 = arith.andi %18, %20 : vector<16x8xi1>
    %22 = arith.ori %16, %21 : vector<16x8xi1>
    %23 = arith.extui %22 : vector<16x8xi1> to vector<16x8xi32>
    %24 = arith.sitofp %23 : vector<16x8xi32> to vector<16x8xf32>
    %25 = arith.addf %13, %24 : vector<16x8xf32>
    %26 = vector.extract_strided_slice %11 {offsets = [1, 0], sizes = [1, 8], strides = [1, 1]} : vector<16x8xf32> to vector<1x8xf32>
    %27 = vector.broadcast %26 : vector<1x8xf32> to vector<16x8xf32>
    %28 = arith.cmpf ogt, %27, %11 : vector<16x8xf32>
    %29 = vector.broadcast %26 : vector<1x8xf32> to vector<16x8xf32>
    %30 = arith.cmpf oeq, %29, %11 : vector<16x8xf32>
    %c1_i32 = arith.constant 1 : i32
    %31 = vector.broadcast %c1_i32 : i32 to vector<16x8xi32>
    %32 = arith.cmpi sgt, %12, %31 : vector<16x8xi32>
    %33 = arith.andi %30, %32 : vector<16x8xi1>
    %34 = arith.ori %28, %33 : vector<16x8xi1>
    %35 = arith.extui %34 : vector<16x8xi1> to vector<16x8xi32>
    %36 = arith.sitofp %35 : vector<16x8xi32> to vector<16x8xf32>
    %37 = arith.addf %25, %36 : vector<16x8xf32>
    %38 = vector.extract_strided_slice %11 {offsets = [2, 0], sizes = [1, 8], strides = [1, 1]} : vector<16x8xf32> to vector<1x8xf32>
    %39 = vector.broadcast %38 : vector<1x8xf32> to vector<16x8xf32>
    %40 = arith.cmpf ogt, %39, %11 : vector<16x8xf32>
    %41 = vector.broadcast %38 : vector<1x8xf32> to vector<16x8xf32>
    %42 = arith.cmpf oeq, %41, %11 : vector<16x8xf32>
    %c2_i32 = arith.constant 2 : i32
    %43 = vector.broadcast %c2_i32 : i32 to vector<16x8xi32>
    %44 = arith.cmpi sgt, %12, %43 : vector<16x8xi32>
    %45 = arith.andi %42, %44 : vector<16x8xi1>
    %46 = arith.ori %40, %45 : vector<16x8xi1>
    %47 = arith.extui %46 : vector<16x8xi1> to vector<16x8xi32>
    %48 = arith.sitofp %47 : vector<16x8xi32> to vector<16x8xf32>
    %49 = arith.addf %37, %48 : vector<16x8xf32>
    %50 = vector.extract_strided_slice %11 {offsets = [3, 0], sizes = [1, 8], strides = [1, 1]} : vector<16x8xf32> to vector<1x8xf32>
    %51 = vector.broadcast %50 : vector<1x8xf32> to vector<16x8xf32>
    %52 = arith.cmpf ogt, %51, %11 : vector<16x8xf32>
    %53 = vector.broadcast %50 : vector<1x8xf32> to vector<16x8xf32>
    %54 = arith.cmpf oeq, %53, %11 : vector<16x8xf32>
    %c3_i32 = arith.constant 3 : i32
    %55 = vector.broadcast %c3_i32 : i32 to vector<16x8xi32>
    %56 = arith.cmpi sgt, %12, %55 : vector<16x8xi32>
    %57 = arith.andi %54, %56 : vector<16x8xi1>
    %58 = arith.ori %52, %57 : vector<16x8xi1>
    %59 = arith.extui %58 : vector<16x8xi1> to vector<16x8xi32>
    %60 = arith.sitofp %59 : vector<16x8xi32> to vector<16x8xf32>
    %61 = arith.addf %49, %60 : vector<16x8xf32>
    %62 = vector.extract_strided_slice %11 {offsets = [4, 0], sizes = [1, 8], strides = [1, 1]} : vector<16x8xf32> to vector<1x8xf32>
    %63 = vector.broadcast %62 : vector<1x8xf32> to vector<16x8xf32>
    %64 = arith.cmpf ogt, %63, %11 : vector<16x8xf32>
    %65 = vector.broadcast %62 : vector<1x8xf32> to vector<16x8xf32>
    %66 = arith.cmpf oeq, %65, %11 : vector<16x8xf32>
    %c4_i32 = arith.constant 4 : i32
    %67 = vector.broadcast %c4_i32 : i32 to vector<16x8xi32>
    %68 = arith.cmpi sgt, %12, %67 : vector<16x8xi32>
    %69 = arith.andi %66, %68 : vector<16x8xi1>
    %70 = arith.ori %64, %69 : vector<16x8xi1>
    %71 = arith.extui %70 : vector<16x8xi1> to vector<16x8xi32>
    %72 = arith.sitofp %71 : vector<16x8xi32> to vector<16x8xf32>
    %73 = arith.addf %61, %72 : vector<16x8xf32>
    %74 = vector.extract_strided_slice %11 {offsets = [5, 0], sizes = [1, 8], strides = [1, 1]} : vector<16x8xf32> to vector<1x8xf32>
    %75 = vector.broadcast %74 : vector<1x8xf32> to vector<16x8xf32>
    %76 = arith.cmpf ogt, %75, %11 : vector<16x8xf32>
    %77 = vector.broadcast %74 : vector<1x8xf32> to vector<16x8xf32>
    %78 = arith.cmpf oeq, %77, %11 : vector<16x8xf32>
    %c5_i32 = arith.constant 5 : i32
    %79 = vector.broadcast %c5_i32 : i32 to vector<16x8xi32>
    %80 = arith.cmpi sgt, %12, %79 : vector<16x8xi32>
    %81 = arith.andi %78, %80 : vector<16x8xi1>
    %82 = arith.ori %76, %81 : vector<16x8xi1>
    %83 = arith.extui %82 : vector<16x8xi1> to vector<16x8xi32>
    %84 = arith.sitofp %83 : vector<16x8xi32> to vector<16x8xf32>
    %85 = arith.addf %73, %84 : vector<16x8xf32>
    %86 = vector.extract_strided_slice %11 {offsets = [6, 0], sizes = [1, 8], strides = [1, 1]} : vector<16x8xf32> to vector<1x8xf32>
    %87 = vector.broadcast %86 : vector<1x8xf32> to vector<16x8xf32>
    %88 = arith.cmpf ogt, %87, %11 : vector<16x8xf32>
    %89 = vector.broadcast %86 : vector<1x8xf32> to vector<16x8xf32>
    %90 = arith.cmpf oeq, %89, %11 : vector<16x8xf32>
    %c6_i32 = arith.constant 6 : i32
    %91 = vector.broadcast %c6_i32 : i32 to vector<16x8xi32>
    %92 = arith.cmpi sgt, %12, %91 : vector<16x8xi32>
    %93 = arith.andi %90, %92 : vector<16x8xi1>
    %94 = arith.ori %88, %93 : vector<16x8xi1>
    %95 = arith.extui %94 : vector<16x8xi1> to vector<16x8xi32>
    %96 = arith.sitofp %95 : vector<16x8xi32> to vector<16x8xf32>
    %97 = arith.addf %85, %96 : vector<16x8xf32>
    %98 = vector.extract_strided_slice %11 {offsets = [7, 0], sizes = [1, 8], strides = [1, 1]} : vector<16x8xf32> to vector<1x8xf32>
    %99 = vector.broadcast %98 : vector<1x8xf32> to vector<16x8xf32>
    %100 = arith.cmpf ogt, %99, %11 : vector<16x8xf32>
    %101 = vector.broadcast %98 : vector<1x8xf32> to vector<16x8xf32>
    %102 = arith.cmpf oeq, %101, %11 : vector<16x8xf32>
    %c7_i32 = arith.constant 7 : i32
    %103 = vector.broadcast %c7_i32 : i32 to vector<16x8xi32>
    %104 = arith.cmpi sgt, %12, %103 : vector<16x8xi32>
    %105 = arith.andi %102, %104 : vector<16x8xi1>
    %106 = arith.ori %100, %105 : vector<16x8xi1>
    %107 = arith.extui %106 : vector<16x8xi1> to vector<16x8xi32>
    %108 = arith.sitofp %107 : vector<16x8xi32> to vector<16x8xf32>
    %109 = arith.addf %97, %108 : vector<16x8xf32>
    %110 = vector.extract_strided_slice %11 {offsets = [8, 0], sizes = [1, 8], strides = [1, 1]} : vector<16x8xf32> to vector<1x8xf32>
    %111 = vector.broadcast %110 : vector<1x8xf32> to vector<16x8xf32>
    %112 = arith.cmpf ogt, %111, %11 : vector<16x8xf32>
    %113 = vector.broadcast %110 : vector<1x8xf32> to vector<16x8xf32>
    %114 = arith.cmpf oeq, %113, %11 : vector<16x8xf32>
    %c8_i32 = arith.constant 8 : i32
    %115 = vector.broadcast %c8_i32 : i32 to vector<16x8xi32>
    %116 = arith.cmpi sgt, %12, %115 : vector<16x8xi32>
    %117 = arith.andi %114, %116 : vector<16x8xi1>
    %118 = arith.ori %112, %117 : vector<16x8xi1>
    %119 = arith.extui %118 : vector<16x8xi1> to vector<16x8xi32>
    %120 = arith.sitofp %119 : vector<16x8xi32> to vector<16x8xf32>
    %121 = arith.addf %109, %120 : vector<16x8xf32>
    %122 = vector.extract_strided_slice %11 {offsets = [9, 0], sizes = [1, 8], strides = [1, 1]} : vector<16x8xf32> to vector<1x8xf32>
    %123 = vector.broadcast %122 : vector<1x8xf32> to vector<16x8xf32>
    %124 = arith.cmpf ogt, %123, %11 : vector<16x8xf32>
    %125 = vector.broadcast %122 : vector<1x8xf32> to vector<16x8xf32>
    %126 = arith.cmpf oeq, %125, %11 : vector<16x8xf32>
    %c9_i32 = arith.constant 9 : i32
    %127 = vector.broadcast %c9_i32 : i32 to vector<16x8xi32>
    %128 = arith.cmpi sgt, %12, %127 : vector<16x8xi32>
    %129 = arith.andi %126, %128 : vector<16x8xi1>
    %130 = arith.ori %124, %129 : vector<16x8xi1>
    %131 = arith.extui %130 : vector<16x8xi1> to vector<16x8xi32>
    %132 = arith.sitofp %131 : vector<16x8xi32> to vector<16x8xf32>
    %133 = arith.addf %121, %132 : vector<16x8xf32>
    %134 = vector.extract_strided_slice %11 {offsets = [10, 0], sizes = [1, 8], strides = [1, 1]} : vector<16x8xf32> to vector<1x8xf32>
    %135 = vector.broadcast %134 : vector<1x8xf32> to vector<16x8xf32>
    %136 = arith.cmpf ogt, %135, %11 : vector<16x8xf32>
    %137 = vector.broadcast %134 : vector<1x8xf32> to vector<16x8xf32>
    %138 = arith.cmpf oeq, %137, %11 : vector<16x8xf32>
    %c10_i32 = arith.constant 10 : i32
    %139 = vector.broadcast %c10_i32 : i32 to vector<16x8xi32>
    %140 = arith.cmpi sgt, %12, %139 : vector<16x8xi32>
    %141 = arith.andi %138, %140 : vector<16x8xi1>
    %142 = arith.ori %136, %141 : vector<16x8xi1>
    %143 = arith.extui %142 : vector<16x8xi1> to vector<16x8xi32>
    %144 = arith.sitofp %143 : vector<16x8xi32> to vector<16x8xf32>
    %145 = arith.addf %133, %144 : vector<16x8xf32>
    %146 = vector.extract_strided_slice %11 {offsets = [11, 0], sizes = [1, 8], strides = [1, 1]} : vector<16x8xf32> to vector<1x8xf32>
    %147 = vector.broadcast %146 : vector<1x8xf32> to vector<16x8xf32>
    %148 = arith.cmpf ogt, %147, %11 : vector<16x8xf32>
    %149 = vector.broadcast %146 : vector<1x8xf32> to vector<16x8xf32>
    %150 = arith.cmpf oeq, %149, %11 : vector<16x8xf32>
    %c11_i32 = arith.constant 11 : i32
    %151 = vector.broadcast %c11_i32 : i32 to vector<16x8xi32>
    %152 = arith.cmpi sgt, %12, %151 : vector<16x8xi32>
    %153 = arith.andi %150, %152 : vector<16x8xi1>
    %154 = arith.ori %148, %153 : vector<16x8xi1>
    %155 = arith.extui %154 : vector<16x8xi1> to vector<16x8xi32>
    %156 = arith.sitofp %155 : vector<16x8xi32> to vector<16x8xf32>
    %157 = arith.addf %145, %156 : vector<16x8xf32>
    %158 = vector.extract_strided_slice %11 {offsets = [12, 0], sizes = [1, 8], strides = [1, 1]} : vector<16x8xf32> to vector<1x8xf32>
    %159 = vector.broadcast %158 : vector<1x8xf32> to vector<16x8xf32>
    %160 = arith.cmpf ogt, %159, %11 : vector<16x8xf32>
    %161 = vector.broadcast %158 : vector<1x8xf32> to vector<16x8xf32>
    %162 = arith.cmpf oeq, %161, %11 : vector<16x8xf32>
    %c12_i32 = arith.constant 12 : i32
    %163 = vector.broadcast %c12_i32 : i32 to vector<16x8xi32>
    %164 = arith.cmpi sgt, %12, %163 : vector<16x8xi32>
    %165 = arith.andi %162, %164 : vector<16x8xi1>
    %166 = arith.ori %160, %165 : vector<16x8xi1>
    %167 = arith.extui %166 : vector<16x8xi1> to vector<16x8xi32>
    %168 = arith.sitofp %167 : vector<16x8xi32> to vector<16x8xf32>
    %169 = arith.addf %157, %168 : vector<16x8xf32>
    %170 = vector.extract_strided_slice %11 {offsets = [13, 0], sizes = [1, 8], strides = [1, 1]} : vector<16x8xf32> to vector<1x8xf32>
    %171 = vector.broadcast %170 : vector<1x8xf32> to vector<16x8xf32>
    %172 = arith.cmpf ogt, %171, %11 : vector<16x8xf32>
    %173 = vector.broadcast %170 : vector<1x8xf32> to vector<16x8xf32>
    %174 = arith.cmpf oeq, %173, %11 : vector<16x8xf32>
    %c13_i32 = arith.constant 13 : i32
    %175 = vector.broadcast %c13_i32 : i32 to vector<16x8xi32>
    %176 = arith.cmpi sgt, %12, %175 : vector<16x8xi32>
    %177 = arith.andi %174, %176 : vector<16x8xi1>
    %178 = arith.ori %172, %177 : vector<16x8xi1>
    %179 = arith.extui %178 : vector<16x8xi1> to vector<16x8xi32>
    %180 = arith.sitofp %179 : vector<16x8xi32> to vector<16x8xf32>
    %181 = arith.addf %169, %180 : vector<16x8xf32>
    %182 = vector.extract_strided_slice %11 {offsets = [14, 0], sizes = [1, 8], strides = [1, 1]} : vector<16x8xf32> to vector<1x8xf32>
    %183 = vector.broadcast %182 : vector<1x8xf32> to vector<16x8xf32>
    %184 = arith.cmpf ogt, %183, %11 : vector<16x8xf32>
    %185 = vector.broadcast %182 : vector<1x8xf32> to vector<16x8xf32>
    %186 = arith.cmpf oeq, %185, %11 : vector<16x8xf32>
    %c14_i32 = arith.constant 14 : i32
    %187 = vector.broadcast %c14_i32 : i32 to vector<16x8xi32>
    %188 = arith.cmpi sgt, %12, %187 : vector<16x8xi32>
    %189 = arith.andi %186, %188 : vector<16x8xi1>
    %190 = arith.ori %184, %189 : vector<16x8xi1>
    %191 = arith.extui %190 : vector<16x8xi1> to vector<16x8xi32>
    %192 = arith.sitofp %191 : vector<16x8xi32> to vector<16x8xf32>
    %193 = arith.addf %181, %192 : vector<16x8xf32>
    %194 = vector.extract_strided_slice %11 {offsets = [15, 0], sizes = [1, 8], strides = [1, 1]} : vector<16x8xf32> to vector<1x8xf32>
    %195 = vector.broadcast %194 : vector<1x8xf32> to vector<16x8xf32>
    %196 = arith.cmpf ogt, %195, %11 : vector<16x8xf32>
    %197 = vector.broadcast %194 : vector<1x8xf32> to vector<16x8xf32>
    %198 = arith.cmpf oeq, %197, %11 : vector<16x8xf32>
    %c15_i32 = arith.constant 15 : i32
    %199 = vector.broadcast %c15_i32 : i32 to vector<16x8xi32>
    %200 = arith.cmpi sgt, %12, %199 : vector<16x8xi32>
    %201 = arith.andi %198, %200 : vector<16x8xi1>
    %202 = arith.ori %196, %201 : vector<16x8xi1>
    %203 = arith.extui %202 : vector<16x8xi1> to vector<16x8xi32>
    %204 = arith.sitofp %203 : vector<16x8xi32> to vector<16x8xf32>
    %205 = arith.addf %193, %204 : vector<16x8xf32>
    %cst_6 = arith.constant 5.000000e+00 : f32
    %206 = vector.broadcast %cst_6 : f32 to vector<16x8xf32>
    %207 = arith.cmpf olt, %205, %206 : vector<16x8xf32>
    %208 = arith.extui %207 : vector<16x8xi1> to vector<16x8xi32>
    %209 = arith.sitofp %208 : vector<16x8xi32> to vector<16x8xf32>
    %cst_7 = arith.constant 5.000000e+00 : f32
    %210 = vector.broadcast %cst_7 : f32 to vector<16x8xf32>
    %211 = arith.cmpf oge, %205, %210 : vector<16x8xf32>
    %cst_8 = arith.constant 1.000000e+01 : f32
    %212 = vector.broadcast %cst_8 : f32 to vector<16x8xf32>
    %213 = arith.cmpf olt, %205, %212 : vector<16x8xf32>
    %214 = arith.andi %211, %213 : vector<16x8xi1>
    %215 = arith.extui %214 : vector<16x8xi1> to vector<16x8xi32>
    %216 = arith.sitofp %215 : vector<16x8xi32> to vector<16x8xf32>
    %217 = math.exp %11 : vector<16x8xf32>
    %218 = arith.mulf %217, %209 : vector<16x8xf32>
    %219 = arith.mulf %217, %216 : vector<16x8xf32>
    %cst_9 = arith.constant dense<0.000000e+00> : vector<8xf32>
    %220 = vector.multi_reduction <add>, %218, %cst_9 [0] : vector<16x8xf32> to vector<8xf32>
    %221 = vector.shape_cast %220 : vector<8xf32> to vector<1x8xf32>
    %222 = vector.broadcast %221 : vector<1x8xf32> to vector<16x8xf32>
    %223 = arith.divf %218, %222 : vector<16x8xf32>
    %cst_10 = arith.constant dense<0.000000e+00> : vector<8xf32>
    %224 = vector.multi_reduction <add>, %219, %cst_10 [0] : vector<16x8xf32> to vector<8xf32>
    %225 = vector.shape_cast %224 : vector<8xf32> to vector<1x8xf32>
    %226 = vector.broadcast %225 : vector<1x8xf32> to vector<16x8xf32>
    %227 = arith.divf %219, %226 : vector<16x8xf32>
    %cst_11 = arith.constant dense<0.000000e+00> : vector<8x128xf32>
    %228 = tpu.matmul %223, %1, %cst_11 {dimension_numbers = #tpu.dot_dimension_numbers<[0], [0], [1], [1], [0, 1, 1, 1], [], []>} : vector<16x8xf32>, vector<16x128xf32>, vector<8x128xf32> -> vector<8x128xf32>
    %cst_12 = arith.constant dense<0.000000e+00> : vector<8x128xf32>
    %229 = tpu.matmul %227, %1, %cst_12 {dimension_numbers = #tpu.dot_dimension_numbers<[0], [0], [1], [1], [0, 1, 1, 1], [], []>} : vector<16x8xf32>, vector<16x128xf32>, vector<8x128xf32> -> vector<8x128xf32>
    %cst_13 = arith.constant 5.000000e-01 : f32
    %230 = vector.broadcast %cst_13 : f32 to vector<8x128xf32>
    %231 = arith.mulf %230, %0 : vector<8x128xf32>
    %cst_14 = arith.constant 5.000000e-01 : f32
    %232 = vector.broadcast %cst_14 : f32 to vector<8x128xf32>
    %233 = arith.mulf %232, %228 : vector<8x128xf32>
    %234 = arith.addf %231, %233 : vector<8x128xf32>
    %c0_15 = arith.constant 0 : index
    %c0_16 = arith.constant 0 : index
    %235 = vector.load %arg3[%c0_15, %c0_16] : memref<8x128xf32, #tpu.memory_space<vmem>>, vector<8x128xf32>
    tpu.vector_store %arg3[%c0_15, %c0_16], %234 {strides = array<i32>} : memref<8x128xf32, #tpu.memory_space<vmem>>, vector<8x128xf32>,
    %cst_17 = arith.constant 0.00999999977 : f32
    %236 = vector.broadcast %cst_17 : f32 to vector<8x128xf32>
    %237 = arith.mulf %236, %0 : vector<8x128xf32>
    %cst_18 = arith.constant 9.900000e-01 : f32
    %238 = vector.broadcast %cst_18 : f32 to vector<8x128xf32>
    %239 = arith.mulf %238, %229 : vector<8x128xf32>
    %240 = arith.addf %237, %239 : vector<8x128xf32>
    %c0_19 = arith.constant 0 : index
    %c0_20 = arith.constant 0 : index
    %241 = vector.load %arg4[%c0_19, %c0_20] : memref<8x128xf32, #tpu.memory_space<vmem>>, vector<8x128xf32>
    tpu.vector_store %arg4[%c0_19, %c0_20], %240 {strides = array<i32>} : memref<8x128xf32, #tpu.memory_space<vmem>>, vector<8x128xf32>,
    return
  }
  func.func @transform_0(%arg0: i32) -> (i32, i32) {
    %c0_i32 = arith.constant 0 : i32
    %c0_i32_0 = arith.constant 0 : i32
    return %arg0, %c0_i32 : i32, i32
  }
  func.func @transform_1(%arg0: i32) -> (i32, i32) {
    %c0_i32 = arith.constant 0 : i32
    %c0_i32_0 = arith.constant 0 : i32
    %c0_i32_1 = arith.constant 0 : i32
    return %c0_i32, %c0_i32_0 : i32, i32
  }
  func.func @transform_2(%arg0: i32) -> (i32, i32) {
    %c0_i32 = arith.constant 0 : i32
    %c0_i32_0 = arith.constant 0 : i32
    return %arg0, %c0_i32 : i32, i32
  }
  func.func @transform_3(%arg0: i32) -> (i32, i32) {
    %c0_i32 = arith.constant 0 : i32
    %c0_i32_0 = arith.constant 0 : i32
    return %arg0, %c0_i32 : i32, i32
  }
}

</mosaic_0001>

<bundles_post_ra>
// kernel: tpu_custom_call.1
= control target key start
LH: loop header
LB: loop body
LE: loop exit
PB: predicated region body
PF: predicated region fallthrough
CT: control target
= control target key end

     0   :  { %9 = vsyncpa [#allocation3], 0  ;;  %s1230_s0 = inlined_call_operand.hbm [shape: f32[8,128], index: 0, kind: input, shape index: {}]   ;;  %s1231_s1 = inlined_call_operand.hbm [shape: f32[16,128], index: 1, kind: input, shape index: {}]   ;;  %s1232_s2 = inlined_call_operand.hbm [shape: f32[8,128], index: 2, kind: output, shape index: {0}]   ;;  %s1233_s3 = inlined_call_operand.hbm [shape: f32[8,128], index: 3, kind: output, shape index: {1}]  }
   0x1   :  { %10 = vsyncpa [#allocation6], 0 }
   0x2   :  { %11 = vsyncpa [#allocation4], 0 }
   0x3   :  { %12 = vsyncpa [#allocation9], 0  ;;  %s943_s12 = smov [#allocation2]   ;;  %s944_s14 = smov [#allocation5]  }
   0x4   :  { %s19_s13 = sshll.u32 %s943_s12, 4  ;;  %s28_s15 = sshll.u32 %s944_s14, 4  ;;  %s20_s13 = int_to_ptr.vmem [resolvable:$true] %s19_s13  ;;  %s29_s15 = int_to_ptr.vmem [resolvable:$true] %s28_s15 }
   0x5   :  { %s863_s16 = scalar_lea.vmem %s20_s13, 128  ;;  %p868_p1 = scmp.lt.s32.totalorder %s20_s13, %s20_s13 }
   0x6   :  { %p864_p0 = scmp.ne.s32.totalorder %s20_s13, %s863_s16  ;;  %p869_p2 = scmp.lt.s32.totalorder %s863_s16, %s863_s16 }
   0x8   :  { %p870_p3 = por %p869_p2, %p868_p1 }
   0xa   :  { %p871_p4 = pnand %p870_p3, %p864_p0 }
   0xc   :  { %874 = shalt.err (!%p871_p4)
}
   0xd   :  { %22 = dma.hbm_to_vmem [thread:$0]  %s1230_s0, 128, %s20_s13, [#allocation3]  }
   0xe   :  { %s883_s19 = scalar_lea.vmem %s29_s15, 256  ;;  %p888_p6 = scmp.lt.s32.totalorder %s29_s15, %s29_s15 }
   0xf   :  { %p884_p5 = scmp.ne.s32.totalorder %s29_s15, %s883_s19  ;;  %p889_p7 = scmp.lt.s32.totalorder %s883_s19, %s883_s19 }
  0x11   :  { %p890_p8 = por %p889_p7, %p888_p6 }
  0x13   :  { %p891_p9 = pnand %p890_p8, %p884_p5 }
  0x15   :  { %894 = shalt.err (!%p891_p9)
}
  0x16   :  { %s945_s20 = smov 128   ;;  %s946_s21 = smov 8  }
  0x17   :  { %34 = dma.hbm_to_vmem [thread:$0]  %s1231_s1, 256, %s29_s15, [#allocation6], %s945_s20, %s945_s20, %s946_s21  }
  0x18   :  { %935 = dma.done.wait [#allocation3], 128  }
  0x19   :  { %936 = vsyncadd [#allocation3], 4294967168 }
  0x1a   :  { %937 = dma.done.wait [#allocation6], 256  }
  0x1b   :  { %938 = vsyncadd [#allocation6], 4294967040  ;;  %v977_v0 = vld [vmem:[#allocation2] sm:$0xff]  ;;  %v42_v1 = vld [vmem:[#allocation5] sm:$0xff]  ;;  %v947_v3 = vmov 0.0   ;;  %vm1234_vm0 = vcmask 64512   ;;  %v147_v30 = vlaneseq }
  0x1c   :  { %814 = vmatprep.subr.mxu0 %v977_v0  ;;  %816 = vmatprep.mubr.f32.mxu0 %v42_v1  ;;  %v43_v2 = vld [vmem:[#allocation5 + $0x8] sm:$0xff]  ;;  %vm948_vm1 = vmmov 0   ;;  %s949_s0 = smov [#allocation7]   ;;  %s950_s24 = smov [#allocation8]  }
  0x1d   :  { %815 = vmatpush3.xpose.msra.mxu0 %v977_v0  ;;  %819 = vmatprep.subr.mxu1 %v947_v3  ;;  %v991_v31 = vshrl.u32 %v147_v30, 7  ;;  %s743_s1 = sshll.u32 %s949_s0, 4  ;;  %s753_s25 = sshll.u32 %s950_s24, 4  ;;  %s744_s1 = int_to_ptr.vmem [resolvable:$true] %s743_s1  ;;  %s754_s25 = int_to_ptr.vmem [resolvable:$true] %s753_s25 }
  0x1e   :  { %826 = vmatprep.subr.mxu0 %v947_v3  ;;  %820 = vmatpush3.msra.mxu1 %v43_v2  ;;  %s895_s26 = scalar_lea.vmem %s744_s1, 128  ;;  %p900_p11 = scmp.lt.s32.totalorder %s744_s1, %s744_s1 }
  0x1f   :  { %821 = vmatprep.subr.mxu1 %v947_v3  ;;  %823 = vmatprep.mubr.msk.f32.mxu1 %vm948_vm1, %v947_v3  ;;  %v152_v32 = vsub.s32 0, %v991_v31  ;;  %v172_v33 = vsub.s32 1, %v991_v31  ;;  %v192_v35 = vsub.s32 2, %v991_v31  ;;  %vm158_vm2 = vcmp.gt.s32.totalorder %v991_v31, 0  ;;  %p896_p10 = scmp.ne.s32.totalorder %s744_s1, %s895_s26  ;;  %p901_p12 = scmp.lt.s32.totalorder %s895_s26, %s895_s26 }
  0x20   :  { %817 = vmatmul.mubr.f32.vlgmr.msra.gmra.mxu0 %v43_v2  ;;  %822 = vmatpush3.msra.mxu1 %v42_v1  ;;  %v212_v41 = vsub.s32 3, %v991_v31  ;;  %vm178_vm9 = vcmp.gt.s32.totalorder %v991_v31, 1  ;;  %v232_v42 = vsub.s32 4, %v991_v31  ;;  %v1028_v45 = vadd.s32 8, %v991_v31 }
  0x21   :  { %827 = vmatpush3.msra.mxu0 %v43_v2  ;;  %830 = vmatprep.mubr.msk.f32.mxu0 %vm948_vm1, %v947_v3  ;;  %v252_v47 = vsub.s32 5, %v991_v31  ;;  %v272_v53 = vsub.s32 6, %v991_v31  ;;  %v292_v58 = vsub.s32 7, %v991_v31  ;;  %p902_p13 = por %p901_p12, %p900_p11 }
  0x22   :  { %828 = vmatprep.subr.mxu0 %v947_v3 }
  0x23   :  { %829 = vmatpush3.msra.mxu0 %v42_v1  ;;  %p903_p0 = pnand %p902_p13, %p896_p10 }
  0xe0   :  { %v818_v4 = vpop.f32.mrf.mxu0 }
  0xe1   :  { %v121_v6 = vsel %vm1234_vm0, %v818_v4, -inf }
  0xe2   :  { %v110_v5 = vpop.f32.mrf.mxu0 }
  0xe3   :  { %v120_v7 = vsel %vm1234_vm0, %v110_v5, -inf }
  0xe4   :  { %v122_v8 = vmax.f32 %v120_v7, %v121_v6 }
  0xe6   :  { %v123_v9 = vrot.slane %v122_v8, 4 }
  0xe8   :  { %v124_v10 = vmax.f32 %v122_v8, %v123_v9 }
  0xea   :  { %v125_v11 = vrot.slane %v124_v10, 2 }
  0xec   :  { %v126_v12 = vmax.f32 %v124_v10, %v125_v11 }
  0xee   :  { %v127_v13 = vrot.slane %v126_v12, 1 }
  0xf0   :  { %v128_v14 = vmax.f32 %v126_v12, %v127_v13 }
  0xf2   :  { %v129_v15 = vsub.f32 %v110_v5, %v128_v14  ;;  %v130_v16 = vsub.f32 %v818_v4, %v128_v14 }
  0xf4   :  { %v131_v17 = vmul.f32 1.442695, %v129_v15  ;;  %v133_v18 = vmul.f32 1.442695, %v130_v16 }
  0xf6   :  { %841 = vpow2.f32 %v131_v17 }
  0xf7   :  { %843 = vpow2.f32 %v133_v18 }
 0x103   :  { %v842_v19 = vpop.eup %841 }
 0x104   :  { %v844_v20 = vpop.eup %843  ;;  %v135_v21 = vsel %vm1234_vm0, %v842_v19, 0.0 }
 0x105   :  { %v136_v22 = vsel %vm1234_vm0, %v844_v20, 0.0 }
 0x106   :  { %v137_v23 = vadd.f32 %v136_v22, %v135_v21 }
 0x108   :  { %v138_v24 = vrot.slane %v137_v23, 4 }
 0x10a   :  { %v139_v25 = vadd.f32 %v138_v24, %v137_v23 }
 0x10c   :  { %v140_v26 = vrot.slane %v139_v25, 2 }
 0x10e   :  { %v141_v27 = vadd.f32 %v140_v26, %v139_v25 }
 0x110   :  { %v142_v28 = vrot.slane %v141_v27, 1 }
 0x112   :  { %v143_v29 = vadd.f32 %v142_v28, %v141_v27 }
 0x114   :  { %845 = vrcp.f32 %v143_v29 }
 0x121   :  { %v846_v34 = vpop.eup %845 }
 0x122   :  { %v996_v36 = vmul.f32 %v846_v34, %v842_v19  ;;  %v998_v37 = vmul.f32 %v846_v34, %v844_v20 }
 0x124   :  { %v153_v38 = vrot.slane %v996_v36, %v152_v32  ;;  %v173_v39 = vrot.slane %v996_v36, %v172_v33  ;;  %v193_v40 = vrot.slane %v996_v36, %v192_v35  ;;  %v213_v43 = vrot.slane %v996_v36, %v212_v41 }
 0x125   :  { %v233_v49 = vrot.slane %v996_v36, %v232_v42  ;;  %v253_v55 = vrot.slane %v996_v36, %v252_v47  ;;  %v273_v61 = vrot.slane %v996_v36, %v272_v53  ;;  %v293_v2 = vrot.slane %v996_v36, %v292_v58 }
 0x126   :  { %vm154_vm3 = vcmp.gt.f32.partialorder %v153_v38, %v996_v36  ;;  %vm155_vm4 = vcmp.gt.f32.partialorder %v153_v38, %v998_v37  ;;  %vm156_vm5 = vcmp.eq.f32.partialorder %v153_v38, %v996_v36  ;;  %vm157_vm6 = vcmp.eq.f32.partialorder %v153_v38, %v998_v37 }
 0x127   :  { %vm160_vm7 = vmand %vm156_vm5, %vm158_vm2  ;;  %vm176_vm8 = vcmp.eq.f32.partialorder %v173_v39, %v996_v36  ;;  %vm174_vm11 = vcmp.gt.f32.partialorder %v173_v39, %v996_v36  ;;  %vm175_vm13 = vcmp.gt.f32.partialorder %v173_v39, %v998_v37  ;;  %vm177_vm14 = vcmp.eq.f32.partialorder %v173_v39, %v998_v37 }
 0x128   :  { %vm162_vm10 = vmor %vm154_vm3, %vm160_vm7  ;;  %vm196_vm1 = vcmp.eq.f32.partialorder %v193_v40, %v996_v36  ;;  %vm198_vm2 = vcmp.gt.s32.totalorder %v991_v31, 2  ;;  %vm197_vm7 = vcmp.eq.f32.partialorder %v193_v40, %v998_v37  ;;  %v313_v5 = vrot.slane %v998_v37, %v152_v32 }
 0x129   :  { %vm163_vm12 = vmor %vm155_vm4, %vm157_vm6  ;;  %v767_v44 = vsel %vm162_vm10, 1.0, %v947_v3  ;;  %vm194_vm4 = vcmp.gt.f32.partialorder %v193_v40, %v996_v36  ;;  %vm195_vm6 = vcmp.gt.f32.partialorder %v193_v40, %v998_v37  ;;  %vm218_vm10 = vcmp.gt.s32.totalorder %v991_v31, 3 }
 0x12a   :  { %vm180_vm15 = vmand %vm176_vm8, %vm178_vm9  ;;  %v768_v46 = vsel %vm163_vm12, 1.0, %v947_v3  ;;  %vm216_vm9 = vcmp.eq.f32.partialorder %v213_v43, %v996_v36  ;;  %vm214_vm12 = vcmp.gt.f32.partialorder %v213_v43, %v996_v36  ;;  %v333_v8 = vrot.slane %v998_v37, %v172_v33 }
 0x12b   :  { %vm182_vm3 = vmor %vm174_vm11, %vm180_vm15  ;;  %vm215_vm15 = vcmp.gt.f32.partialorder %v213_v43, %v998_v37  ;;  %v353_v13 = vrot.slane %v998_v37, %v192_v35  ;;  %v373_v17 = vrot.slane %v998_v37, %v212_v41  ;;  %v393_v25 = vrot.slane %v998_v37, %v232_v42 }
 0x12c   :  { %vm183_vm5 = vmor %vm175_vm13, %vm177_vm14  ;;  %v769_v48 = vsel %vm182_vm3, 1.0, %v947_v3  ;;  %vm238_vm13 = vcmp.gt.s32.totalorder %v991_v31, 4  ;;  %vm217_vm3 = vcmp.eq.f32.partialorder %v213_v43, %v998_v37  ;;  %v413_v27 = vrot.slane %v998_v37, %v252_v47 }
 0x12d   :  { %v770_v50 = vsel %vm183_vm5, 1.0, %v947_v3  ;;  %v188_v51 = vadd.f32 %v769_v48, %v767_v44  ;;  %vm200_vm8 = vmand %vm196_vm1, %vm198_vm2  ;;  %vm236_vm2 = vcmp.eq.f32.partialorder %v233_v49, %v996_v36  ;;  %vm234_vm5 = vcmp.gt.f32.partialorder %v233_v49, %v996_v36 }
 0x12e   :  { %v189_v52 = vadd.f32 %v770_v50, %v768_v46  ;;  %vm202_vm11 = vmor %vm194_vm4, %vm200_vm8  ;;  %v486_v30 = vmul.f32 1.442695, %v996_v36  ;;  %v488_v34 = vmul.f32 1.442695, %v998_v37  ;;  %v433_v39 = vrot.slane %v998_v37, %v272_v53 }
 0x12f   :  { %vm203_vm14 = vmor %vm195_vm6, %vm197_vm7  ;;  %v771_v54 = vsel %vm202_vm11, 1.0, %v947_v3  ;;  %vm258_vm6 = vcmp.gt.s32.totalorder %v991_v31, 5  ;;  %vm278_vm7 = vcmp.gt.s32.totalorder %v991_v31, 6  ;;  %vm235_vm11 = vcmp.gt.f32.partialorder %v233_v49, %v998_v37 }
 0x130   :  { %v772_v56 = vsel %vm203_vm14, 1.0, %v947_v3  ;;  %v208_v57 = vadd.f32 %v771_v54, %v188_v51  ;;  %vm220_vm1 = vmand %vm216_vm9, %vm218_vm10  ;;  %vm237_vm14 = vcmp.eq.f32.partialorder %v233_v49, %v998_v37  ;;  %vm256_vm10 = vcmp.eq.f32.partialorder %v253_v55, %v996_v36 }
 0x131   :  { %v209_v59 = vadd.f32 %v772_v56, %v189_v52  ;;  %vm222_vm4 = vmor %vm214_vm12, %vm220_vm1  ;;  %vm319_vm12 = vcmp.gt.s32.totalorder %v1028_v45, 8  ;;  %vm297_vm1 = vcmp.eq.f32.partialorder %v293_v2, %v998_v37  ;;  %847 = vpow2.f32 %v486_v30 }
 0x132   :  { %vm223_vm8 = vmor %vm215_vm15, %vm217_vm3  ;;  %v773_v60 = vsel %vm222_vm4, 1.0, %v947_v3  ;;  %vm254_vm3 = vcmp.gt.f32.partialorder %v253_v55, %v996_v36  ;;  %849 = vpow2.f32 %v488_v34  ;;  %v453_v48 = vrot.slane %v998_v37, %v292_v58 }
 0x133   :  { %v774_v62 = vsel %vm223_vm8, 1.0, %v947_v3  ;;  %v228_v63 = vadd.f32 %v773_v60, %v208_v57  ;;  %vm240_vm9 = vmand %vm236_vm2, %vm238_vm13  ;;  %vm255_vm8 = vcmp.gt.f32.partialorder %v253_v55, %v998_v37  ;;  %vm257_vm13 = vcmp.eq.f32.partialorder %v253_v55, %v998_v37 }
 0x134   :  { %v229_v1 = vadd.f32 %v774_v62, %v209_v59  ;;  %vm242_vm15 = vmor %vm234_vm5, %vm240_vm9  ;;  %vm276_vm5 = vcmp.eq.f32.partialorder %v273_v61, %v996_v36  ;;  %vm274_vm9 = vcmp.gt.f32.partialorder %v273_v61, %v996_v36 }
 0x135   :  { %vm243_vm4 = vmor %vm235_vm11, %vm237_vm14  ;;  %v775_v4 = vsel %vm242_vm15, 1.0, %v947_v3  ;;  %vm275_vm15 = vcmp.gt.f32.partialorder %v273_v61, %v998_v37  ;;  %vm379_vm11 = vcmp.gt.s32.totalorder %v1028_v45, 11 }
 0x136   :  { %v776_v6 = vsel %vm243_vm4, 1.0, %v947_v3  ;;  %v248_v7 = vadd.f32 %v775_v4, %v228_v63  ;;  %vm260_vm2 = vmand %vm256_vm10, %vm258_vm6  ;;  %vm277_vm4 = vcmp.eq.f32.partialorder %v273_v61, %v998_v37  ;;  %vm294_vm6 = vcmp.gt.f32.partialorder %v293_v2, %v996_v36 }
 0x137   :  { %v249_v9 = vadd.f32 %v776_v6, %v229_v1  ;;  %vm262_vm14 = vmor %vm254_vm3, %vm260_vm2  ;;  %vm295_vm10 = vcmp.gt.f32.partialorder %v293_v2, %v998_v37  ;;  %vm317_vm2 = vcmp.eq.f32.partialorder %v313_v5, %v998_v37  ;;  %v781_v16 = vsel %vm294_vm6, 1.0, %v947_v3 }
 0x138   :  { %vm263_vm0 = vmor %vm255_vm8, %vm257_vm13  ;;  %v777_v10 = vsel %vm262_vm14, 1.0, %v947_v3  ;;  %vm314_vm8 = vcmp.gt.f32.partialorder %v313_v5, %v996_v36  ;;  %vm399_vm14 = vcmp.gt.s32.totalorder %v1028_v45, 12 }
 0x139   :  { %v778_v11 = vsel %vm263_vm0, 1.0, %v947_v3  ;;  %v268_v12 = vadd.f32 %v777_v10, %v248_v7  ;;  %vm280_vm3 = vmand %vm276_vm5, %vm278_vm7  ;;  %vm334_vm0 = vcmp.gt.f32.partialorder %v333_v8, %v996_v36  ;;  %vm315_vm5 = vcmp.gt.f32.partialorder %v313_v5, %v998_v37 }
 0x13a   :  { %v269_v14 = vadd.f32 %v778_v11, %v249_v9  ;;  %vm282_vm13 = vmor %vm274_vm9, %vm280_vm3  ;;  %v783_v20 = vsel %vm314_vm8, 1.0, %v947_v3  ;;  %vm335_vm3 = vcmp.gt.f32.partialorder %v333_v8, %v998_v37  ;;  %v785_v22 = vsel %vm334_vm0, 1.0, %v947_v3 }
 0x13b   :  { %vm283_vm7 = vmor %vm275_vm15, %vm277_vm4  ;;  %v779_v15 = vsel %vm282_vm13, 1.0, %v947_v3  ;;  %vm337_vm15 = vcmp.eq.f32.partialorder %v333_v8, %v998_v37  ;;  %vm419_vm4 = vcmp.gt.s32.totalorder %v1028_v45, 13  ;;  %vm357_vm8 = vcmp.eq.f32.partialorder %v353_v13, %v998_v37 }
 0x13c   :  { %v780_v18 = vsel %vm283_vm7, 1.0, %v947_v3  ;;  %v288_v19 = vadd.f32 %v779_v15, %v268_v12  ;;  %vm303_vm9 = vmor %vm295_vm10, %vm297_vm1  ;;  %vm354_vm1 = vcmp.gt.f32.partialorder %v353_v13, %v996_v36  ;;  %vm1235_vm13 = vcmp.gt.s32.totalorder %v1028_v45, 9 }
 0x13d   :  { %v289_v21 = vadd.f32 %v780_v18, %v269_v14  ;;  %vm321_vm6 = vmand %vm317_vm2, %vm319_vm12  ;;  %v782_v23 = vsel %vm303_vm9, 1.0, %v947_v3  ;;  %vm439_vm12 = vcmp.gt.s32.totalorder %v1028_v45, 14  ;;  %vm355_vm0 = vcmp.gt.f32.partialorder %v353_v13, %v998_v37 }
 0x13e   :  { %v308_v24 = vadd.f32 %v781_v16, %v288_v19  ;;  %vm323_vm10 = vmor %vm315_vm5, %vm321_vm6  ;;  %vm374_vm7 = vcmp.gt.f32.partialorder %v373_v17, %v996_v36  ;;  %vm377_vm9 = vcmp.eq.f32.partialorder %v373_v17, %v998_v37  ;;  %v787_v33 = vsel %vm354_vm1, 1.0, %v947_v3  ;;  %v848_v1 = vpop.eup %847 }
 0x13f   :  { %v309_v26 = vadd.f32 %v782_v23, %v289_v21  ;;  %vm341_vm2 = vmand %vm337_vm15, %vm1235_vm13  ;;  %v784_v28 = vsel %vm323_vm10, 1.0, %v947_v3  ;;  %vm1236_vm15 = vcmp.gt.s32.totalorder %v1028_v45, 10  ;;  %vm375_vm13 = vcmp.gt.f32.partialorder %v373_v17, %v998_v37 }
 0x140   :  { %v328_v29 = vadd.f32 %v783_v20, %v308_v24  ;;  %vm343_vm5 = vmor %vm335_vm3, %vm341_vm2  ;;  %vm397_vm10 = vcmp.eq.f32.partialorder %v393_v25, %v998_v37  ;;  %v789_v41 = vsel %vm374_vm7, 1.0, %v947_v3  ;;  %vm395_vm2 = vcmp.gt.f32.partialorder %v393_v25, %v998_v37 }
 0x141   :  { %v329_v32 = vadd.f32 %v784_v28, %v309_v26  ;;  %vm361_vm6 = vmand %vm357_vm8, %vm1236_vm15  ;;  %v786_v35 = vsel %vm343_vm5, 1.0, %v947_v3  ;;  %vm394_vm8 = vcmp.gt.f32.partialorder %v393_v25, %v996_v36  ;;  %vm417_vm5 = vcmp.eq.f32.partialorder %v413_v27, %v998_v37 }
 0x142   :  { %v348_v38 = vadd.f32 %v785_v22, %v328_v29  ;;  %vm363_vm3 = vmor %vm355_vm0, %vm361_vm6  ;;  %vm437_vm6 = vcmp.eq.f32.partialorder %v433_v39, %v998_v37  ;;  %v791_v50 = vsel %vm394_vm8, 1.0, %v947_v3  ;;  %vm454_vm8 = vcmp.gt.f32.partialorder %v453_v48, %v996_v36 }
 0x143   :  { %v349_v40 = vadd.f32 %v786_v35, %v329_v32  ;;  %vm381_vm1 = vmand %vm377_vm9, %vm379_vm11  ;;  %v788_v42 = vsel %vm363_vm3, 1.0, %v947_v3  ;;  %vm414_vm11 = vcmp.gt.f32.partialorder %v413_v27, %v996_v36  ;;  %vm415_vm9 = vcmp.gt.f32.partialorder %v413_v27, %v998_v37 }
 0x144   :  { %v368_v43 = vadd.f32 %v787_v33, %v348_v38  ;;  %vm383_vm0 = vmor %vm375_vm13, %vm381_vm1  ;;  %vm435_vm13 = vcmp.gt.f32.partialorder %v433_v39, %v998_v37  ;;  %v793_v31 = vsel %vm414_vm11, 1.0, %v947_v3  ;;  %v797_v61 = vsel %vm454_vm8, 1.0, %v947_v3 }
 0x145   :  { %v369_v44 = vadd.f32 %v788_v42, %v349_v40  ;;  %vm401_vm15 = vmand %vm397_vm10, %vm399_vm14  ;;  %v790_v46 = vsel %vm383_vm0, 1.0, %v947_v3  ;;  %vm434_vm10 = vcmp.gt.f32.partialorder %v433_v39, %v996_v36  ;;  %v729_v38 = vmul.f32 0.5, %v977_v0 }
 0x146   :  { %v388_v47 = vadd.f32 %v789_v41, %v368_v43  ;;  %vm403_vm7 = vmor %vm395_vm2, %vm401_vm15  ;;  %v795_v57 = vsel %vm434_vm10, 1.0, %v947_v3  ;;  %vm455_vm2 = vcmp.gt.f32.partialorder %v453_v48, %v998_v37  ;;  %v850_v37 = vpop.eup %849  ;;  %v733_v40 = vmul.f32 0.01, %v977_v0 }
 0x147   :  { %v389_v49 = vadd.f32 %v790_v46, %v369_v44  ;;  %vm421_vm14 = vmand %vm417_vm5, %vm419_vm4  ;;  %v792_v51 = vsel %vm403_vm7, 1.0, %v947_v3  ;;  %v798_v45 = vsel %vm455_vm2, 1.0, %v947_v3 }
 0x148   :  { %v408_v52 = vadd.f32 %v791_v50, %v388_v47  ;;  %vm423_vm3 = vmor %vm415_vm9, %vm421_vm14  ;;  %vm1237_vm14 = vcmask 64512  }
 0x149   :  { %v409_v53 = vadd.f32 %v792_v51, %v389_v49  ;;  %vm441_vm1 = vmand %vm437_vm6, %vm439_vm12  ;;  %v794_v54 = vsel %vm423_vm3, 1.0, %v947_v3 }
 0x14a   :  { %v428_v55 = vadd.f32 %v793_v31, %v408_v52  ;;  %vm443_vm4 = vmor %vm435_vm13, %vm441_vm1  ;;  %vm550_vm1 = vcmask 130048  }
 0x14b   :  { %v429_v56 = vadd.f32 %v794_v54, %v409_v53  ;;  %v796_v58 = vsel %vm443_vm4, 1.0, %v947_v3  ;;  %vm1238_vm13 = vmmov %vm1237_vm14 }
 0x14c   :  { %v448_v59 = vadd.f32 %v795_v57, %v428_v55  ;;  %vm1239_vm3 = vmmov %vm1238_vm13 }
 0x14d   :  { %v449_v60 = vadd.f32 %v796_v58, %v429_v56  ;;  %vm1240_vm10 = vmmov %vm1239_vm3 }
 0x14e   :  { %v468_v62 = vadd.f32 %v797_v61, %v448_v59 }
 0x14f   :  { %v469_v63 = vadd.f32 %v798_v45, %v449_v60 }
 0x150   :  { %vm470_vm12 = vcmp.lt.f32.partialorder %v468_v62, 5.0  ;;  %vm476_vm0 = vcmp.ge.f32.partialorder %v468_v62, 5.0  ;;  %vm478_vm5 = vcmp.lt.f32.partialorder %v468_v62, 10.0 }
 0x151   :  { %vm471_vm15 = vcmp.lt.f32.partialorder %v469_v63, 5.0  ;;  %v799_v36 = vsel %vm470_vm12, 1.0, %v947_v3  ;;  %vm477_vm11 = vcmp.ge.f32.partialorder %v469_v63, 5.0  ;;  %vm479_vm9 = vcmp.lt.f32.partialorder %v469_v63, 10.0  ;;  %vm480_vm7 = vmand %vm476_vm0, %vm478_vm5 }
 0x152   :  { %v800_v2 = vsel %vm471_vm15, 1.0, %v947_v3  ;;  %v490_v4 = vmul.f32 %v848_v1, %v799_v36  ;;  %vm481_vm6 = vmand %vm477_vm11, %vm479_vm9  ;;  %v801_v5 = vsel %vm480_vm7, 1.0, %v947_v3 }
 0x153   :  { %v491_v6 = vmul.f32 %v850_v37, %v800_v2  ;;  %v802_v7 = vsel %vm481_vm6, 1.0, %v947_v3  ;;  %v492_v8 = vmul.f32 %v848_v1, %v801_v5 }
 0x154   :  { %v494_v9 = vsel %vm1237_vm14, %v490_v4, 0.0  ;;  %v493_v10 = vmul.f32 %v850_v37, %v802_v7 }
 0x155   :  { %v495_v11 = vsel %vm1238_vm13, %v491_v6, 0.0  ;;  %v506_v12 = vsel %vm1239_vm3, %v492_v8, 0.0 }
 0x156   :  { %v496_v13 = vadd.f32 %v495_v11, %v494_v9  ;;  %v507_v14 = vsel %vm1240_vm10, %v493_v10, 0.0 }
 0x157   :  { %v508_v15 = vadd.f32 %v507_v14, %v506_v12 }
 0x158   :  { %v497_v16 = vrot.slane %v496_v13, 4 }
 0x159   :  { %v509_v17 = vrot.slane %v508_v15, 4 }
 0x15a   :  { %v498_v18 = vadd.f32 %v497_v16, %v496_v13 }
 0x15b   :  { %v510_v19 = vadd.f32 %v509_v17, %v508_v15 }
 0x15c   :  { %v499_v20 = vrot.slane %v498_v18, 2 }
 0x15d   :  { %v511_v21 = vrot.slane %v510_v19, 2 }
 0x15e   :  { %v500_v22 = vadd.f32 %v499_v20, %v498_v18 }
 0x15f   :  { %v512_v3 = vadd.f32 %v511_v21, %v510_v19 }
 0x160   :  { %v501_v23 = vrot.slane %v500_v22, 1 }
 0x161   :  { %v513_v24 = vrot.slane %v512_v3, 1 }
 0x162   :  { %v502_v25 = vadd.f32 %v501_v23, %v500_v22 }
 0x163   :  { %v514_v26 = vadd.f32 %v513_v24, %v512_v3 }
 0x164   :  { %851 = vrcp.f32 %v502_v25 }
 0x165   :  { %853 = vrcp.f32 %v514_v26 }
 0x171   :  { %v852_v27 = vpop.eup %851 }
 0x172   :  { %v854_v28 = vpop.eup %853  ;;  %v504_v29 = vmul.f32 %v852_v27, %v490_v4  ;;  %v505_v32 = vmul.f32 %v852_v27, %v491_v6 }
 0x173   :  { %v516_v30 = vmul.f32 %v854_v28, %v492_v8  ;;  %v517_v33 = vmul.f32 %v854_v28, %v493_v10 }
 0x174   :  { %518 = vxpose.xlu0.b32.start [1/2] (short) (narrow) %v504_v29, 8 }
 0x175   :  { %624 = vxpose.xlu1.b32.start [1/2] (short) (narrow) %v516_v30, 8 }
 0x178   :  { %519 = vxpose.xlu0.b32.end [2/2] (short) (narrow) %v505_v32, 8 }
 0x179   :  { %625 = vxpose.xlu1.b32.end [2/2] (short) (narrow) %v517_v33, 8 }
 0x1f0   :  { %v534_v34 = vpop.trf.xlu0 }
 0x1f1   :  { %v640_v35 = vpop.trf.xlu1  ;;  %824 = vmatmul.mubr.msk.f32.vlgmr.msra.gmra.mxu1 %vm550_vm1, %v534_v34 }
 0x1f2   :  { %831 = vmatmul.mubr.msk.f32.vlgmr.msra.gmra.mxu0 %vm550_vm1, %v640_v35 }
 0x2b1   :  { %v620_v39 = vpop.f32.mrf.mxu1 }
 0x2b2   :  { %v730_v41 = vmul.f32 0.5, %v620_v39  ;;  %v725_v42 = vpop.f32.mrf.mxu0 }
 0x2b3   :  { %v734_v43 = vmul.f32 0.99, %v725_v42  ;;  %v825_v44 = vpop.f32.mrf.mxu1 }
 0x2b4   :  { %v731_v46 = vadd.f32 %v730_v41, %v729_v38  ;;  %v832_v47 = vpop.f32.mrf.mxu0 }
 0x2b5   :  { %v735_v48 = vadd.f32 %v734_v43, %v733_v40 }
 0x2b6   :  { %732 = vst [vmem:[#allocation7] sm:$0xff] %v731_v46 }
 0x2b7   :  { %736 = vst [vmem:[#allocation8] sm:$0xff] %v735_v48 }
 0x2b8   :  { %906 = shalt.err (!%p903_p0)
}
 0x2b9   :  { %746 = dma.vmem_to_hbm [thread:$0]  %s744_s1, 128, %s1232_s2, [#allocation4]  }
 0x2ba   :  { %s915_s29 = scalar_lea.vmem %s754_s25, 128  ;;  %p920_p2 = scmp.lt.s32.totalorder %s754_s25, %s754_s25 }
 0x2bb   :  { %p916_p1 = scmp.ne.s32.totalorder %s754_s25, %s915_s29  ;;  %p921_p3 = scmp.lt.s32.totalorder %s915_s29, %s915_s29 }
 0x2bd   :  { %p922_p4 = por %p921_p3, %p920_p2 }
 0x2bf   :  { %p923_p5 = pnand %p922_p4, %p916_p1 }
 0x2c1   :  { %926 = shalt.err (!%p923_p5)
}
 0x2c2   :  { %756 = dma.vmem_to_hbm [thread:$0]  %s754_s25, 128, %s1233_s3, [#allocation9]  }
 0x2c3   :  { %939 = dma.done.wait [#allocation4], 128  }
 0x2c4   :  { %940 = vsyncadd [#allocation4], 4294967168 }
 0x2c5   :  { %941 = dma.done.wait [#allocation9], 128  }
 0x2c6   :  { %942 = vsyncadd [#allocation9], 4294967168 }
 0x2c7   :  { %763 = vsyncpa [#allocation3], 1 }
 0x2c8   :  { %764 = vsyncpa [#allocation6], 1 }
 0x2c9   :  { %765 = vsyncpa [#allocation4], 1 }
 0x2ca   :  { %766 = vsyncpa [#allocation9], 1 }

</bundles_post_ra>
